<compile_context>
chip_gen: v7x
topology: tpu7x:2x2x1
jax: 0.10.0
libtpu: 0.0.40
codegen_flags: <defaults>
</compile_context>

<pallas_src>
import jax
import jax.numpy as jnp
from jax.experimental import pallas as pl
from jax.experimental.pallas import tpu as pltpu


_LANE = 128        # lane width: batch tiles must be a multiple of this
_MIN_SPLIT = 1024  # only split a single covering tile in two above this size


def _mlp_kernel(xt_ref, w1_ref, b1_ref, w2_ref, b2_ref, ot_ref):
    # Transposed ("batch on the lane axis") layout:
    #   xt : [D_in, tile]   w1 : [H, D_in]   b1 : [H, 1]
    #   h^T   = sigmoid(W1 @ x^T + b1)   -> [H, tile]
    #   out^T = W2 @ h^T + b2            -> [D_out, tile]  (lane-dense store)
    h = jnp.dot(w1_ref[...], xt_ref[...],
                preferred_element_type=jnp.float32) + b1_ref[...]
    h = jax.nn.sigmoid(h)                       # nn.Sigmoid(); exp -> EUP
    out = jnp.dot(w2_ref[...], h,
                  preferred_element_type=jnp.float32) + b2_ref[...]
    ot_ref[...] = out.astype(ot_ref.dtype)


def _round_up(n, m):
    return ((n + m - 1) // m) * m


def _choose_tile(b_pad, max_tile):
    if b_pad > max_tile:
        return max_tile
    # A single tile would cover everything; if there is enough work, split it
    # in two so the "parallel" batch axis can use both TensorCores on v7x.
    if b_pad >= _MIN_SPLIT and (b_pad // 2) % _LANE == 0:
        return b_pad // 2
    return b_pad


def single_hidden_forward(x, w1, b1, w2, b2, *, max_batch_tile=4096):
    """x: [B, D_in]; w1: [H, D_in]; b1: [H]; w2: [D_out, H]; b2: [D_out]."""
    B, D_in = x.shape
    H = w1.shape[0]
    D_out = w2.shape[0]

    # Lane-dense transposed layout: batch on the 128-lane axis.
    b_pad = _round_up(max(B, _LANE), _LANE)
    tile = _choose_tile(b_pad, max_batch_tile)
    b_pad = _round_up(b_pad, tile)
    grid = (b_pad // tile,)

    xt = x.T                                   # [D_in, B] (cheap XLA transpose)
    if b_pad != B:
        xt = jnp.pad(xt, ((0, 0), (0, b_pad - B)))
    b1_2d = b1.reshape(H, 1)                   # broadcasts along the lane axis
    b2_2d = b2.reshape(D_out, 1)

    cost = pl.CostEstimate(
        flops=2 * b_pad * (D_in * H + H * D_out),
        transcendentals=b_pad * H,
        bytes_accessed=4 * (b_pad * (D_in + D_out)
                            + D_in * H + H * D_out + H + D_out),
    )

    out_t = pl.pallas_call(
        _mlp_kernel,
        out_shape=jax.ShapeDtypeStruct((D_out, b_pad), x.dtype),
        grid=grid,
        in_specs=[
            pl.BlockSpec((D_in, tile), lambda i: (0, i)),   # x^T batch tile
            pl.BlockSpec((H, D_in), lambda i: (0, 0)),      # W1, VMEM-resident
            pl.BlockSpec((H, 1), lambda i: (0, 0)),         # b1, VMEM-resident
            pl.BlockSpec((D_out, H), lambda i: (0, 0)),     # W2, VMEM-resident
            pl.BlockSpec((D_out, 1), lambda i: (0, 0)),     # b2, VMEM-resident
        ],
        out_specs=pl.BlockSpec((D_out, tile), lambda i: (0, i)),
        compiler_params=pltpu.CompilerParams(
            # No-op on single-TC v5e/v6e; shards the batch grid on v7x.
            dimension_semantics=("parallel",)),
        cost_estimate=cost,
    )(xt, w1, b1_2d, w2, b2_2d)

    return out_t[:, :B].T                      # back to [B, D_out]


if __name__ == "__main__":
    # Shapes implied by the module: input_dim=16, hidden_list=[32], output_dim=8.
    D_in, H, D_out = 16, 32, 8

    key = jax.random.PRNGKey(0)
    k_w1, k_b1, k_w2, k_b2, k_x1, k_x2 = jax.random.split(key, 6)

    # Deterministic synthetic params mimicking nn.Linear shapes.
    w1 = jax.random.normal(k_w1, (H, D_in), dtype=jnp.float32) * 0.1
    b1 = jax.random.normal(k_b1, (H,), dtype=jnp.float32) * 0.1
    w2 = jax.random.normal(k_w2, (D_out, H), dtype=jnp.float32) * 0.1
    b2 = jax.random.normal(k_b2, (D_out,), dtype=jnp.float32) * 0.1

    def reference(x):
        return jax.nn.sigmoid(x @ w1.T + b1) @ w2.T + b2

    # 1) Tiny batch: padded to a single 128-lane tile, grid = (1,).
    x_small = jax.random.normal(k_x1, (8, D_in), dtype=jnp.float32)
    out_small = jax.block_until_ready(
        single_hidden_forward(x_small, w1, b1, w2, b2))
    assert out_small.shape == (8, D_out)
    assert jnp.allclose(out_small, reference(x_small), atol=1e-5, rtol=1e-5), \
        "small-batch mismatch vs reference"

    # 2) Batch not a multiple of the tile: padded to 1024, tile 512, grid = (2,)
    #    (exercises the padded tail and the two-TensorCore split on v7x).
    x_big = jax.random.normal(k_x2, (1000, D_in), dtype=jnp.float32)
    out_big = jax.block_until_ready(
        single_hidden_forward(x_big, w1, b1, w2, b2))
    assert out_big.shape == (1000, D_out)
    assert jnp.allclose(out_big, reference(x_big), atol=1e-5, rtol=1e-5), \
        "padded/tiled-batch mismatch vs reference"

    print("KERNEL_OK")
</pallas_src>

<mosaic_0001>
module attributes {stable_mosaic.version = 11 : i64} {
  func.func @_mlp_kernel(%arg0: i32, %arg1: memref<16x128xf32, #tpu.memory_space<vmem>>, %arg2: memref<32x16xf32, #tpu.memory_space<vmem>>, %arg3: memref<32x1xf32, #tpu.memory_space<vmem>>, %arg4: memref<8x32xf32, #tpu.memory_space<vmem>>, %arg5: memref<8x1xf32, #tpu.memory_space<vmem>>, %arg6: memref<8x128xf32, #tpu.memory_space<vmem>>) attributes {dimension_semantics = [#tpu.dimension_semantics<parallel>], iteration_bounds = array<i64: 1>, scalar_prefetch = 0 : i64, scratch_operands = 0 : i64, tpu.core_type = #tpu.core_type<tc>, window_params = [{transform_indices = @transform_0, window_bounds = array<i64: 16, 128>}, {pipeline_mode = #tpu.pipeline_mode<synchronous>, transform_indices = @transform_1, window_bounds = array<i64: 32, 16>}, {pipeline_mode = #tpu.pipeline_mode<synchronous>, transform_indices = @transform_2, window_bounds = array<i64: 32, 1>}, {pipeline_mode = #tpu.pipeline_mode<synchronous>, transform_indices = @transform_3, window_bounds = array<i64: 8, 32>}, {pipeline_mode = #tpu.pipeline_mode<synchronous>, transform_indices = @transform_4, window_bounds = array<i64: 8, 1>}, {transform_indices = @transform_5, window_bounds = array<i64: 8, 128>}]} {
    %c0 = arith.constant 0 : index
    %c0_0 = arith.constant 0 : index
    %0 = vector.load %arg2[%c0, %c0_0] : memref<32x16xf32, #tpu.memory_space<vmem>>, vector<32x16xf32>
    %c0_1 = arith.constant 0 : index
    %c0_2 = arith.constant 0 : index
    %1 = vector.load %arg1[%c0_1, %c0_2] : memref<16x128xf32, #tpu.memory_space<vmem>>, vector<16x128xf32>
    %cst = arith.constant dense<0.000000e+00> : vector<32x128xf32>
    %2 = tpu.matmul %0, %1, %cst {dimension_numbers = #tpu.dot_dimension_numbers<[1], [0], [0], [1], [0, 0, 1, 1], [], []>} : vector<32x16xf32>, vector<16x128xf32>, vector<32x128xf32> -> vector<32x128xf32>
    %c0_3 = arith.constant 0 : index
    %c0_4 = arith.constant 0 : index
    %3 = vector.load %arg3[%c0_3, %c0_4] : memref<32x1xf32, #tpu.memory_space<vmem>>, vector<32x1xf32>
    %4 = vector.broadcast %3 : vector<32x1xf32> to vector<32x128xf32>
    %5 = arith.addf %2, %4 : vector<32x128xf32>
    %6 = arith.negf %5 : vector<32x128xf32>
    %7 = math.exp %6 : vector<32x128xf32>
    %cst_5 = arith.constant 1.000000e+00 : f32
    %8 = vector.broadcast %cst_5 : f32 to vector<32x128xf32>
    %9 = arith.addf %8, %7 : vector<32x128xf32>
    %10 = arith.divf %8, %9 : vector<32x128xf32>
    %c0_6 = arith.constant 0 : index
    %c0_7 = arith.constant 0 : index
    %11 = vector.load %arg4[%c0_6, %c0_7] : memref<8x32xf32, #tpu.memory_space<vmem>>, vector<8x32xf32>
    %cst_8 = arith.constant dense<0.000000e+00> : vector<8x128xf32>
    %12 = tpu.matmul %11, %10, %cst_8 {dimension_numbers = #tpu.dot_dimension_numbers<[1], [0], [0], [1], [0, 0, 1, 1], [], []>} : vector<8x32xf32>, vector<32x128xf32>, vector<8x128xf32> -> vector<8x128xf32>
    %c0_9 = arith.constant 0 : index
    %c0_10 = arith.constant 0 : index
    %13 = vector.load %arg5[%c0_9, %c0_10] : memref<8x1xf32, #tpu.memory_space<vmem>>, vector<8x1xf32>
    %14 = vector.broadcast %13 : vector<8x1xf32> to vector<8x128xf32>
    %15 = arith.addf %12, %14 : vector<8x128xf32>
    %c0_11 = arith.constant 0 : index
    %c0_12 = arith.constant 0 : index
    %16 = vector.load %arg6[%c0_11, %c0_12] : memref<8x128xf32, #tpu.memory_space<vmem>>, vector<8x128xf32>
    tpu.vector_store %arg6[%c0_11, %c0_12], %15 {strides = array<i32>} : memref<8x128xf32, #tpu.memory_space<vmem>>, vector<8x128xf32>,
    return
  }
  func.func @transform_0(%arg0: i32) -> (i32, i32) {
    %c0_i32 = arith.constant 0 : i32
    %c0_i32_0 = arith.constant 0 : i32
    return %c0_i32, %arg0 : i32, i32
  }
  func.func @transform_1(%arg0: i32) -> (i32, i32) {
    %c0_i32 = arith.constant 0 : i32
    %c0_i32_0 = arith.constant 0 : i32
    %c0_i32_1 = arith.constant 0 : i32
    return %c0_i32, %c0_i32_0 : i32, i32
  }
  func.func @transform_2(%arg0: i32) -> (i32, i32) {
    %c0_i32 = arith.constant 0 : i32
    %c0_i32_0 = arith.constant 0 : i32
    %c0_i32_1 = arith.constant 0 : i32
    return %c0_i32, %c0_i32_0 : i32, i32
  }
  func.func @transform_3(%arg0: i32) -> (i32, i32) {
    %c0_i32 = arith.constant 0 : i32
    %c0_i32_0 = arith.constant 0 : i32
    %c0_i32_1 = arith.constant 0 : i32
    return %c0_i32, %c0_i32_0 : i32, i32
  }
  func.func @transform_4(%arg0: i32) -> (i32, i32) {
    %c0_i32 = arith.constant 0 : i32
    %c0_i32_0 = arith.constant 0 : i32
    %c0_i32_1 = arith.constant 0 : i32
    return %c0_i32, %c0_i32_0 : i32, i32
  }
  func.func @transform_5(%arg0: i32) -> (i32, i32) {
    %c0_i32 = arith.constant 0 : i32
    %c0_i32_0 = arith.constant 0 : i32
    return %c0_i32, %arg0 : i32, i32
  }
}

</mosaic_0001>

<bundles_post_ra>
// kernel: tpu_custom_call.1
= control target key start
LH: loop header
LB: loop body
LE: loop exit
PB: predicated region body
PF: predicated region fallthrough
CT: control target
= control target key end

     0   :  { %vm51_vm0 = vcmask 130048   ;;  %v367_v4 = vmov 0   ;;  %s454_s0 = inlined_call_operand.vmem [shape: f32[16,128], index: 0, kind: input, shape index: {}]   ;;  %s455_s1 = inlined_call_operand.vmem [shape: f32[32,16], index: 1, kind: input, shape index: {}]   ;;  %s456_s2 = inlined_call_operand.vmem [shape: f32[32,1], index: 2, kind: input, shape index: {}]   ;;  %s457_s3 = inlined_call_operand.vmem [shape: f32[8,32], index: 3, kind: input, shape index: {}]   ;;  %s458_s4 = inlined_call_operand.vmem [shape: f32[8,1], index: 4, kind: input, shape index: {}]   ;;  %s459_s5 = inlined_call_operand.hbm [shape: f32[8,128], index: 5, kind: output, shape index: {}]  }
   0x1   :  { %v25_v0 = vld [vmem:[%s454_s0] sm:$0xff]  ;;  %v26_v1 = vld [vmem:[%s454_s0 + $0x8] sm:$0xff]  ;;  %325 = vset.pattern.permute.xlu0 %v367_v4  ;;  %326 = vset.pattern.permute.xlu1 %v367_v4  ;;  %v29_v6 = vld [vmem:[%s456_s2 + $0x10] sm:$0xff] }
   0x2   :  { %v21_v2 = vld [vmem:[%s455_s1] sm:$0xff]  ;;  %v310_v3 = vpack.c.bf16 %v26_v1, %v25_v0 }
   0x3   :  { %293 = vmatprep.mubr.msk.f32.mxu0 %vm51_vm0, %v21_v2  ;;  %v27_v5 = vld [vmem:[%s456_s2] sm:$0xff] }
   0x4   :  { %311 = vmatprep.subr.bf16.mxu0 %v310_v3  ;;  %33 = vperm.xlu0 %325, %v27_v5  }
   0x5   :  { %10 = vsyncpa [#allocation3], 0  ;;  %313 = vmatpush3.bf16.msra.mxu0 %v310_v3  ;;  %v22_v7 = vld [vmem:[%s455_s1 + $0x8] sm:$0xff]  ;;  %43 = vperm.xlu1 %326, %v29_v6   ;;  %v23_v9 = vld [vmem:[%s455_s1 + $0x10] sm:$0xff]  ;;  %v368_v13 = vmov 0.0|0.0   ;;  %vm369_vm1 = vmmov 0  }
   0x6   :  { %v28_v8 = vld [vmem:[%s456_s2 + $0x8] sm:$0xff]  ;;  %v30_v10 = vld [vmem:[%s456_s2 + $0x18] sm:$0xff]  ;;  %v174_v12 = vld [vmem:[%s458_s4] sm:$0xff]  ;;  %314 = vmatprep.subr.bf16.mxu1 %v368_v13  ;;  %v370_v14 = vmov 0.0   ;;  %vm180_vm2 = vcmask 261120   ;;  %s371_s4 = smov [#allocation2]  }
   0x7   :  { %v24_v11 = vld [vmem:[%s455_s1 + $0x18] sm:$0xff]  ;;  %307 = vmatprep.mubr.msk.f32.mxu1 %vm369_vm1, %v370_v14  ;;  %v173_v45 = vld [vmem:[%s457_s3] sm:$0xff]  ;;  %s261_s14 = sshll.u32 %s371_s4, 4  ;;  %s262_s14 = int_to_ptr.vmem [resolvable:$true] %s261_s14 }
   0x8   :  { %294 = vmatmul.mubr.msk.f32.vlgmr.msra.gmra.mrb[0].mxu0 %vm51_vm0, %v22_v7  ;;  %38 = vperm.xlu0 %325, %v28_v8   ;;  %s343_s15 = scalar_lea.vmem %s262_s14, 128  ;;  %p348_p1 = scmp.lt.s32.totalorder %s262_s14, %s262_s14 }
   0x9   :  { %296 = vmatprep.mubr.msk.f32.mxu0 %vm51_vm0, %v23_v9  ;;  %48 = vperm.xlu1 %326, %v30_v10   ;;  %p344_p0 = scmp.ne.s32.totalorder %s262_s14, %s343_s15  ;;  %p349_p2 = scmp.lt.s32.totalorder %s343_s15, %s343_s15 }
   0xb   :  { %p350_p3 = por %p349_p2, %p348_p1 }
   0xc   :  { %297 = vmatmul.mubr.msk.f32.gmra.mrb[2].mxu0 %vm51_vm0, %v24_v11  ;;  %177 = vperm.xlu0 %325, %v174_v12  }
   0xd   :  { %p351_p4 = pnand %p350_p3, %p344_p0 }
  0x83   :  { %v34_v15 = vpop.permute.xlu0 %33 }
  0x84   :  { %v44_v16 = vpop.permute.xlu1 %43 }
  0x87   :  { %v39_v17 = vpop.permute.xlu0 %38 }
  0x88   :  { %v49_v23 = vpop.permute.xlu1 %48 }
  0x8b   :  { %v178_v46 = vpop.permute.xlu0 %177 }
  0xdb   :  { %v295_v18 = vpop.f32.mrb[0].mxu0 }
  0xdc   :  { %v136_v19 = vadd.f32 %v295_v18, %v39_v17  ;;  %v130_v20 = vpop.f32.mrb[1].mxu0 }
  0xdd   :  { %v131_v21 = vadd.f32 %v130_v20, %v34_v15 }
  0xde   :  { %v274_v22 = vmul.f32 -1.442695, %v136_v19 }
  0xdf   :  { %v273_v24 = vmul.f32 -1.442695, %v131_v21  ;;  %v298_v25 = vpop.f32.mrb[2].mxu0 }
  0xe0   :  { %327 = vpow2.f32 %v274_v22  ;;  %v146_v26 = vadd.f32 %v298_v25, %v49_v23  ;;  %v140_v27 = vpop.f32.mrb[3].mxu0 }
  0xe1   :  { %329 = vpow2.f32 %v273_v24  ;;  %v141_v28 = vadd.f32 %v140_v27, %v44_v16 }
  0xe2   :  { %v276_v29 = vmul.f32 -1.442695, %v146_v26 }
  0xe3   :  { %v275_v30 = vmul.f32 -1.442695, %v141_v28 }
  0xe4   :  { %331 = vpow2.f32 %v276_v29 }
  0xe5   :  { %333 = vpow2.f32 %v275_v30 }
  0xea   :  { %v328_v31 = vpop.eup %327 }
  0xeb   :  { %v330_v32 = vpop.eup %329  ;;  %v162_v33 = vadd.f32 1.0, %v328_v31 }
  0xec   :  { %v161_v34 = vadd.f32 1.0, %v330_v32 }
  0xed   :  { %335 = vrcp.f32 %v162_v33 }
  0xee   :  { %v332_v35 = vpop.eup %331  ;;  %337 = vrcp.f32 %v161_v34 }
  0xef   :  { %v334_v36 = vpop.eup %333  ;;  %v164_v37 = vadd.f32 1.0, %v332_v35 }
  0xf0   :  { %v163_v38 = vadd.f32 1.0, %v334_v36 }
  0xf1   :  { %339 = vrcp.f32 %v164_v37 }
  0xf2   :  { %341 = vrcp.f32 %v163_v38 }
  0xf7   :  { %v336_v39 = vpop.eup %335 }
  0xf8   :  { %v338_v40 = vpop.eup %337 }
  0xf9   :  { %v315_v41 = vpack.c.bf16 %v336_v39, %v338_v40 }
  0xfb   :  { %v340_v42 = vpop.eup %339  ;;  %316 = vmatpush3.bf16.msra.mxu1 %v315_v41 }
  0xfc   :  { %v342_v43 = vpop.eup %341  ;;  %317 = vmatprep.subr.bf16.mxu1 %v368_v13 }
  0xfd   :  { %v318_v44 = vpack.c.bf16 %v340_v42, %v342_v43 }
  0xff   :  { %319 = vmatpush3.bf16.msra.mxu1 %v318_v44 }
 0x102   :  { %308 = vmatmul.mubr.msk.f32.vlgmr.msra.gmra.mrb[0].mxu1 %vm180_vm2, %v173_v45 }
 0x1d5   :  { %v250_v47 = vpop.f32.mrb[0].mxu1 }
 0x1d6   :  { %v251_v48 = vadd.f32 %v250_v47, %v178_v46  ;;  %v309_v49 = vpop.f32.mrb[1].mxu1 }
 0x1d8   :  { %254 = vst [vmem:[#allocation2] sm:$0xff] %v251_v48 }
 0x1d9   :  { %354 = shalt.err (!%p351_p4)
}
 0x1da   :  { %s355_s3 = scalar_lea.hbm %s459_s5, 128 }
 0x1db   :  { %p356_p5 = scmp.ne.s32.totalorder %s459_s5, %s355_s3  ;;  %p359_p6 = scmp.lt.u32.totalorder %s355_s3, %s459_s5 }
 0x1dd   :  { %p361_p7 = pnand %p359_p6, %p356_p5 }
 0x1df   :  { %364 = shalt.err (!%p361_p7)
}
 0x1e0   :  { %264 = dma.vmem_to_hbm [thread:$0]  %s262_s14, 128, %s459_s5, [#allocation3]  }
 0x1e1   :  { %365 = dma.done.wait [#allocation3], 128  }
 0x1e2   :  { %366 = vsyncadd [#allocation3], 4294967168 }
 0x1e3   :  { %268 = vsyncpa [#allocation3], 1 }

</bundles_post_ra>
